<compile_context>
chip_gen: v7x
topology: tpu7x:2x2x1
jax: 0.10.0
libtpu: 0.0.40
codegen_flags: <defaults>
</compile_context>

<pallas_src>
import math
import functools

import jax
import jax.numpy as jnp
from jax import lax
from jax.experimental import pallas as pl
from jax.experimental.pallas import tpu as pltpu

ANY_SPEC = pl.BlockSpec(memory_space=pl.ANY)
SMEM_SPEC = pl.BlockSpec(memory_space=pltpu.MemorySpace.SMEM)

# Default tile targets (fit the default 32 MiB scoped VMEM at Llama dims).
# TODO(synk): per-generation re-budget: TILE_M=512 + vmem_limit_bytes on v6e
# (weight-bandwidth roofline); TILE_H=128 / bf16 FFN blocks on v7x (64 MiB VMEM).
TILE_M = 256     # GEMM row tile
TILE_N = 256     # GEMM output-column tile
TILE_H = 256     # FFN hidden tile
TILE_Q = 256     # attention query tile
TILE_KV = 512    # attention KV tile (flash axis)


def _tile(dim, target):
    """Largest tile <= target that evenly divides dim; ragged dims degrade to
    smaller tiles instead of an untiled whole-dimension block."""
    if dim <= target:
        return dim
    t = target
    while t >= 8:
        if dim % t == 0:
            return t
        t //= 2
    return dim  # TODO(synk): pad ragged dims instead of giving up on tiling.


# ----------------------------- Pallas kernels ------------------------------

def rmsnorm_matmul_kernel(x_ref, nw_ref, w_ref, o_ref, xn_ref, *, eps):
    """o = rmsnorm(x) @ W.  The normalized activation is computed once per row
    block (j == 0) into a bf16 VMEM scratch and reused for every output tile."""
    @pl.when(pl.program_id(1) == 0)
    def _():
        x = x_ref[...]                                   # (tm, D) f32
        ms = jnp.mean(x * x, axis=-1, keepdims=True)     # fp32 stats
        xn_ref[...] = ((x * lax.rsqrt(ms + eps)) * nw_ref[...]).astype(jnp.bfloat16)

    o_ref[...] = jnp.dot(xn_ref[...], w_ref[...],
                         preferred_element_type=jnp.float32).astype(o_ref.dtype)


def matmul_residual_kernel(a_ref, w_ref, r_ref, o_ref):
    """o = a @ W + r   (wo projection with fused residual add)."""
    o_ref[...] = r_ref[...] + jnp.dot(a_ref[...], w_ref[...],
                                      preferred_element_type=jnp.float32)


def ffn_kernel(h_ref, nw_ref, w1_ref, w3_ref, w2_ref, o_ref, acc_ref, xn_ref, *, eps):
    """o = h + W2( silu(W1(rmsnorm(h))) * W3(rmsnorm(h)) ).
    Hidden dim tiled on grid axis 1 (reduction axis); fp32 VMEM accumulator with
    fused residual; rmsnorm'd activation cached in bf16 scratch at j == 0."""
    j = pl.program_id(1)

    @pl.when(j == 0)
    def _():
        x = h_ref[...]                                   # (tm, D) f32
        ms = jnp.mean(x * x, axis=-1, keepdims=True)
        xn_ref[...] = ((x * lax.rsqrt(ms + eps)) * nw_ref[...]).astype(jnp.bfloat16)
        acc_ref[...] = x                                 # fused residual

    xn = xn_ref[...]
    h1 = jnp.dot(xn, w1_ref[...], preferred_element_type=jnp.float32)
    h3 = jnp.dot(xn, w3_ref[...], preferred_element_type=jnp.float32)
    g = (h1 * jax.nn.sigmoid(h1)) * h3                   # SwiGLU, fp32
    acc_ref[...] += jnp.dot(g.astype(jnp.bfloat16), w2_ref[...],
                            preferred_element_type=jnp.float32)

    @pl.when(j == pl.num_programs(1) - 1)
    def _():
        o_ref[...] = acc_ref[...]


def rope_cache_kernel(xq_ref, xk_ref, xv_ref, cos_ref, sin_ref, pos_ref,
                      ck_in, cv_in, qo_ref, ck_out, cv_out,
                      k_scr, v_scr, sem, *, n_kv_heads, seq_tile):
    """Fused RoPE (de-interleaved per-head layout) + KV-cache scatter.
    start_pos arrives as an SMEM scalar (no recompile of this kernel per step);
    the cache is updated in place via aliased HBM outputs and explicit DMAs."""
    del ck_in, cv_in                                     # aliased with the outputs
    b = pl.program_id(0)
    i = pl.program_id(1)
    pos = pos_ref[0] + i * seq_tile

    c = cos_ref[...]                                     # (ts, 1, Dh/2) f32
    s = sin_ref[...]

    def rope(x):                                         # (ts, H, Dh) bf16
        xf = x.astype(jnp.float32)
        dh2 = xf.shape[-1] // 2
        xr, xi = xf[..., :dh2], xf[..., dh2:]
        # wq / wk columns were permuted offline to [evens, odds] per head, so
        # this half-split rotation is exactly the reference complex rotation.
        return jnp.concatenate([xr * c - xi * s, xr * s + xi * c], axis=-1)

    qo_ref[0] = rope(xq_ref[0]).astype(qo_ref.dtype)

    k_rot = rope(xk_ref[0]).astype(k_scr.dtype)          # (ts, Hkv, Dh)
    v_cur = xv_ref[0]                                    # (ts, Hkv, Dh) bf16
    for g in range(n_kv_heads):                          # stage head-major for one contiguous DMA
        k_scr[g] = k_rot[:, g, :]
        v_scr[g] = v_cur[:, g, :]

    ck_copy = pltpu.make_async_copy(
        k_scr, ck_out.at[b, :, pl.ds(pos, seq_tile), :], sem.at[0])
    cv_copy = pltpu.make_async_copy(
        v_scr, cv_out.at[b, :, pl.ds(pos, seq_tile), :], sem.at[1])
    ck_copy.start()
    cv_copy.start()
    ck_copy.wait()
    cv_copy.wait()


def flash_attn_kernel(q_ref, k_ref, v_ref, o_ref, m_sc, l_sc, acc_sc, *,
                      scale, n_heads, n_rep, head_dim, kv_len, kv_tile):
    """Flash-style attention.  grid = (batch, q-tiles, kv-tiles).  Per-head
    online-softmax state lives in VMEM scratch; the GQA group is a leading-dim
    index of the (Hkv, tkv, Dh) cache block (no relayout).  NOTE: the reference
    SelfAttention applies NO causal mask, so none is applied here."""
    t = pl.program_id(2)

    @pl.when(t == 0)
    def _():
        m_sc[...] = jnp.full_like(m_sc, -jnp.inf)
        l_sc[...] = jnp.zeros_like(l_sc)
        acc_sc[...] = jnp.zeros_like(acc_sc)

    q = q_ref[0]                                          # (tq, Hq*Dh) bf16
    # Mask cache slots >= kv_len (only the tail of the last tile).
    pos = t * kv_tile + lax.broadcasted_iota(jnp.int32, (1, kv_tile), 1)
    valid = pos < kv_len

    for h in range(n_heads):          # static unroll; per-head state is in VMEM scratch
        g = h // n_rep
        qh = q[:, h * head_dim:(h + 1) * head_dim]        # (tq, Dh) static lane slice
        kg = k_ref[0, g]                                  # (tkv, Dh) leading-dim index
        vg = v_ref[0, g]
        sc = lax.dot_general(qh, kg, (((1,), (1,)), ((), ())),
                             preferred_element_type=jnp.float32) * scale
        sc = jnp.where(valid, sc, -1e30)
        m_prev = m_sc[h]
        l_prev = l_sc[h]
        m_new = jnp.maximum(m_prev, jnp.max(sc, axis=-1, keepdims=True))
        alpha = jnp.exp(m_prev - m_new)
        p = jnp.exp(sc - m_new)
        l_sc[h] = alpha * l_prev + jnp.sum(p, axis=-1, keepdims=True)
        acc_sc[h] = alpha * acc_sc[h] + lax.dot_general(
            p.astype(jnp.bfloat16), vg, (((1,), (0,)), ((), ())),
            preferred_element_type=jnp.float32)
        m_sc[h] = m_new

    @pl.when(t == pl.num_programs(2) - 1)
    def _():
        for h in range(n_heads):      # lane-dense writeback, no concat/transpose
            o_ref[0, :, h * head_dim:(h + 1) * head_dim] = (
                acc_sc[h] * pl.reciprocal(l_sc[h], approx=True)).astype(o_ref.dtype)
    # TODO(synk): grid over heads (v7x dual-core decode) and fold the n_rep heads
    # of a group into the matmul M dim for S=1 decode MXU occupancy.


# ----------------------------- wrappers -------------------------------------

def rmsnorm_matmul(x2d, norm_w, w_t, eps):
    M, D = x2d.shape
    N = w_t.shape[1]
    tm, tn = _tile(M, TILE_M), _tile(N, TILE_N)
    return pl.pallas_call(
        functools.partial(rmsnorm_matmul_kernel, eps=eps),
        out_shape=jax.ShapeDtypeStruct((M, N), jnp.bfloat16),
        grid=(M // tm, N // tn),
        in_specs=[
            pl.BlockSpec((tm, D), lambda i, j: (i, 0)),
            pl.BlockSpec((1, D), lambda i, j: (0, 0)),
            pl.BlockSpec((D, tn), lambda i, j: (0, j)),
        ],
        out_specs=pl.BlockSpec((tm, tn), lambda i, j: (i, j)),
        scratch_shapes=[pltpu.VMEM((tm, D), jnp.bfloat16)],
        compiler_params=pltpu.CompilerParams(
            dimension_semantics=("parallel", "arbitrary")),
    )(x2d, norm_w.reshape(1, D), w_t)


def matmul_residual(a2d, w_t, r2d):
    M, K = a2d.shape
    N = w_t.shape[1]
    tm, tn = _tile(M, TILE_M), _tile(N, TILE_N)
    return pl.pallas_call(
        matmul_residual_kernel,
        out_shape=jax.ShapeDtypeStruct((M, N), jnp.float32),
        grid=(M // tm, N // tn),
        in_specs=[
            pl.BlockSpec((tm, K), lambda i, j: (i, 0)),
            pl.BlockSpec((K, tn), lambda i, j: (0, j)),
            pl.BlockSpec((tm, tn), lambda i, j: (i, j)),
        ],
        out_specs=pl.BlockSpec((tm, tn), lambda i, j: (i, j)),
        compiler_params=pltpu.CompilerParams(
            dimension_semantics=("parallel", "parallel")),
    )(a2d, w_t, r2d)


def feed_forward_fused(h2d, norm_w, w1_t, w3_t, w2_t, eps):
    M, D = h2d.shape
    H = w1_t.shape[1]
    tm, th = _tile(M, TILE_M), _tile(H, TILE_H)
    return pl.pallas_call(
        functools.partial(ffn_kernel, eps=eps),
        out_shape=jax.ShapeDtypeStruct((M, D), jnp.float32),
        grid=(M // tm, H // th),
        in_specs=[
            pl.BlockSpec((tm, D), lambda i, j: (i, 0)),
            pl.BlockSpec((1, D), lambda i, j: (0, 0)),
            pl.BlockSpec((D, th), lambda i, j: (0, j)),
            pl.BlockSpec((D, th), lambda i, j: (0, j)),
            pl.BlockSpec((th, D), lambda i, j: (j, 0)),
        ],
        out_specs=pl.BlockSpec((tm, D), lambda i, j: (i, 0)),
        scratch_shapes=[pltpu.VMEM((tm, D), jnp.float32),
                        pltpu.VMEM((tm, D), jnp.bfloat16)],
        compiler_params=pltpu.CompilerParams(
            dimension_semantics=("parallel", "arbitrary")),
    )(h2d, norm_w.reshape(1, D), w1_t, w3_t, w2_t)


def rope_and_cache_update(xq, xk, xv, cos, sin, start_pos, cache_k, cache_v):
    """xq: (B,S,Hq,Dh) bf16, xk/xv: (B,S,Hkv,Dh) bf16 (de-interleaved q/k layout).
    Returns rotated q (bf16) and the in-place-updated bf16 caches
    (layout (maxB, Hkv, maxT, Dh))."""
    B, S, Hq, Dh = xq.shape
    Hkv = xk.shape[2]
    ts = _tile(S, TILE_M)
    pos_arr = jnp.asarray([start_pos], dtype=jnp.int32)
    cos3 = cos.reshape(S, 1, Dh // 2).astype(jnp.float32)
    sin3 = sin.reshape(S, 1, Dh // 2).astype(jnp.float32)

    kernel = functools.partial(rope_cache_kernel, n_kv_heads=Hkv, seq_tile=ts)
    return pl.pallas_call(
        kernel,
        out_shape=(jax.ShapeDtypeStruct((B, S, Hq, Dh), jnp.bfloat16),
                   jax.ShapeDtypeStruct(cache_k.shape, cache_k.dtype),
                   jax.ShapeDtypeStruct(cache_v.shape, cache_v.dtype)),
        grid=(B, S // ts),
        in_specs=[
            pl.BlockSpec((1, ts, Hq, Dh), lambda b, i: (b, i, 0, 0)),
            pl.BlockSpec((1, ts, Hkv, Dh), lambda b, i: (b, i, 0, 0)),
            pl.BlockSpec((1, ts, Hkv, Dh), lambda b, i: (b, i, 0, 0)),
            pl.BlockSpec((ts, 1, Dh // 2), lambda b, i: (i, 0, 0)),
            pl.BlockSpec((ts, 1, Dh // 2), lambda b, i: (i, 0, 0)),
            SMEM_SPEC,                 # start_pos scalar
            ANY_SPEC, ANY_SPEC,        # aliased caches (HBM)
        ],
        out_specs=(pl.BlockSpec((1, ts, Hq, Dh), lambda b, i: (b, i, 0, 0)),
                   ANY_SPEC, ANY_SPEC),
        scratch_shapes=[pltpu.VMEM((Hkv, ts, Dh), jnp.bfloat16),
                        pltpu.VMEM((Hkv, ts, Dh), jnp.bfloat16),
                        pltpu.SemaphoreType.DMA((2,))],
        input_output_aliases={6: 1, 7: 2},
        compiler_params=pltpu.CompilerParams(
            dimension_semantics=("arbitrary", "arbitrary")),
    )(xq, xk, xv, cos3, sin3, pos_arr, cache_k, cache_v)


def flash_attention(q, cache_k, cache_v, *, n_heads, n_kv_heads, kv_len, scale):
    """q: (B, S, Hq*Dh) bf16; cache_k/v: (maxB, Hkv, maxT, Dh) bf16.
    Returns lane-dense (B, S, Hq*Dh) bf16."""
    B, S, Dq = q.shape
    _, Hkv, maxT, Dh = cache_k.shape
    assert kv_len <= maxT
    tq = _tile(S, TILE_Q)
    tkv = _tile(maxT, TILE_KV)
    kernel = functools.partial(
        flash_attn_kernel, scale=scale, n_heads=n_heads,
        n_rep=n_heads // n_kv_heads, head_dim=Dh, kv_len=kv_len, kv_tile=tkv)
    return pl.pallas_call(
        kernel,
        out_shape=jax.ShapeDtypeStruct((B, S, Dq), jnp.bfloat16),
        grid=(B, S // tq, pl.cdiv(kv_len, tkv)),
        in_specs=[
            pl.BlockSpec((1, tq, Dq), lambda b, i, t: (b, i, 0)),
            pl.BlockSpec((1, Hkv, tkv, Dh), lambda b, i, t: (b, 0, t, 0)),
            pl.BlockSpec((1, Hkv, tkv, Dh), lambda b, i, t: (b, 0, t, 0)),
        ],
        out_specs=pl.BlockSpec((1, tq, Dq), lambda b, i, t: (b, i, 0)),
        scratch_shapes=[
            pltpu.VMEM((n_heads, tq, 1), jnp.float32),    # m
            pltpu.VMEM((n_heads, tq, 1), jnp.float32),    # l
            pltpu.VMEM((n_heads, tq, Dh), jnp.float32),   # acc
        ],
        compiler_params=pltpu.CompilerParams(
            dimension_semantics=("parallel", "parallel", "arbitrary")),
    )(q, cache_k, cache_v)


# ----------------------------- glue / module --------------------------------

def deinterleave_heads(w_t, n_heads, head_dim):
    """Permute per-head output columns of a (in, n_heads*head_dim) weight to
    [even indices..., odd indices...] so in-kernel RoPE is a half-split rotate.
    Scores are invariant to this permutation (applied to both wq and wk)."""
    d_in, n = w_t.shape
    w = w_t.reshape(d_in, n_heads, head_dim // 2, 2)
    return jnp.concatenate([w[..., 0], w[..., 1]], axis=-1).reshape(d_in, n)


def precompute_freqs(head_dim, seq_len, start_pos=0, theta=10000.0):
    inv = 1.0 / (theta ** (jnp.arange(0, head_dim, 2, dtype=jnp.float32) / head_dim))
    t = jnp.arange(start_pos, start_pos + seq_len, dtype=jnp.float32)
    freqs = jnp.outer(t, inv)
    return jnp.cos(freqs), jnp.sin(freqs)


def encoder_block(params, x, start_pos, cos, sin, cache_k, cache_v,
                  n_heads, n_kv_heads, norm_eps):
    B, S, D = x.shape
    head_dim = D // n_heads
    Dq = n_heads * head_dim
    Dkv = n_kv_heads * head_dim
    T = start_pos + S      # static; TODO(synk): recompile-free decode via maxT grid + masking

    x2d = x.reshape(B * S, D)

    # fused RMSNorm + QKV projection (one tiled GEMM, bf16 out)
    qkv = rmsnorm_matmul(x2d, params["attn_norm_w"], params["wqkv_t"], norm_eps)
    xq = qkv[:, :Dq].reshape(B, S, n_heads, head_dim)
    xk = qkv[:, Dq:Dq + Dkv].reshape(B, S, n_kv_heads, head_dim)
    xv = qkv[:, Dq + Dkv:].reshape(B, S, n_kv_heads, head_dim)

    # fused RoPE + in-place (aliased) KV-cache scatter
    q_rot, cache_k, cache_v = rope_and_cache_update(
        xq, xk, xv, cos, sin, start_pos, cache_k, cache_v)

    # flash attention over the bf16 cache, lane-dense bf16 output
    attn = flash_attention(q_rot.reshape(B, S, Dq), cache_k, cache_v,
                           n_heads=n_heads, n_kv_heads=n_kv_heads, kv_len=T,
                           scale=1.0 / math.sqrt(head_dim))

    # wo projection with fused residual add: h = x + attn @ Wo^T
    h2d = matmul_residual(attn.reshape(B * S, Dq), params["wo_t"], x2d)

    # fused RMSNorm + SwiGLU + W2 + residual
    out2d = feed_forward_fused(h2d, params["ffn_norm_w"],
                               params["w1_t"], params["w3_t"], params["w2_t"],
                               norm_eps)
    return out2d.reshape(B, S, D), cache_k, cache_v


# ----------------------------- fp32 reference --------------------------------

def reference_encoder_block(w, x, start_pos, cos, sin, n_heads, n_kv_heads, eps,
                            max_batch, max_seq_len):
    B, S, D = x.shape
    Dh = D // n_heads
    n_rep = n_heads // n_kv_heads

    def rmsnorm(v, g):
        return g * (v * lax.rsqrt(jnp.mean(v * v, axis=-1, keepdims=True) + eps))

    def rope_interleaved(t):
        tr, ti = t[..., 0::2], t[..., 1::2]
        c = cos[None, :, None, :]
        s = sin[None, :, None, :]
        return jnp.stack([tr * c - ti * s, tr * s + ti * c], axis=-1).reshape(t.shape)

    xn = rmsnorm(x, w["attn_norm_w"])
    xq = (xn @ w["wq_t"]).reshape(B, S, n_heads, Dh)
    xk = (xn @ w["wk_t"]).reshape(B, S, n_kv_heads, Dh)
    xv = (xn @ w["wv_t"]).reshape(B, S, n_kv_heads, Dh)
    xq, xk = rope_interleaved(xq), rope_interleaved(xk)

    ck = jnp.zeros((max_batch, max_seq_len, n_kv_heads, Dh), jnp.float32)
    cv = jnp.zeros_like(ck)
    ck = ck.at[:B, start_pos:start_pos + S].set(xk)
    cv = cv.at[:B, start_pos:start_pos + S].set(xv)
    keys = jnp.repeat(ck[:B, :start_pos + S], n_rep, axis=2)
    vals = jnp.repeat(cv[:B, :start_pos + S], n_rep, axis=2)

    q = xq.transpose(0, 2, 1, 3)
    k = keys.transpose(0, 2, 1, 3)
    v = vals.transpose(0, 2, 1, 3)
    scores = jnp.einsum("bhsd,bhtd->bhst", q, k) / math.sqrt(Dh)
    p = jax.nn.softmax(scores, axis=-1)                     # no causal mask (matches module)
    attn = jnp.einsum("bhst,bhtd->bhsd", p, v).transpose(0, 2, 1, 3).reshape(B, S, -1)
    h = x + attn @ w["wo_t"]
    hn = rmsnorm(h, w["ffn_norm_w"])
    ff = (jax.nn.silu(hn @ w["w1_t"]) * (hn @ w["w3_t"])) @ w["w2_t"]
    return h + ff


# ----------------------------- main -------------------------------------------

if __name__ == "__main__":
    dim = 64
    n_heads = 4
    n_kv_heads = 2
    head_dim = dim // n_heads
    multiple_of = 32
    norm_eps = 1e-5
    max_batch = 2
    max_seq_len = 16
    batch, seq_len, start_pos = 2, 8, 0

    hidden = 4 * dim
    hidden = int(2 * hidden / 3)
    hidden = multiple_of * ((hidden + multiple_of - 1) // multiple_of)   # 192

    key = jax.random.PRNGKey(0)
    ks = jax.random.split(key, 8)
    init = lambda k, shape: 0.02 * jax.random.normal(k, shape, dtype=jnp.float32)

    # fp32 reference weights in (in, out) layout (= torch nn.Linear weight.T)
    wq_t = init(ks[0], (dim, n_heads * head_dim))
    wk_t = init(ks[1], (dim, n_kv_heads * head_dim))
    wv_t = init(ks[2], (dim, n_kv_heads * head_dim))
    wo_t = init(ks[3], (n_heads * head_dim, dim))
    w1_t = init(ks[4], (dim, hidden))
    w3_t = init(ks[5], (dim, hidden))
    w2_t = init(ks[6], (hidden, dim))
    attn_norm_w = jnp.ones((dim,), jnp.float32)
    ffn_norm_w = jnp.ones((dim,), jnp.float32)

    params = {
        # bf16 weights for the MXU; wq/wk columns permuted per-head for fused RoPE.
        "wqkv_t": jnp.concatenate(
            [deinterleave_heads(wq_t, n_heads, head_dim),
             deinterleave_heads(wk_t, n_kv_heads, head_dim),
             wv_t], axis=1).astype(jnp.bfloat16),
        "wo_t": wo_t.astype(jnp.bfloat16),
        "w1_t": w1_t.astype(jnp.bfloat16),
        "w3_t": w3_t.astype(jnp.bfloat16),
        "w2_t": w2_t.astype(jnp.bfloat16),
        "attn_norm_w": attn_norm_w,
        "ffn_norm_w": ffn_norm_w,
    }

    x = jax.random.normal(ks[7], (batch, seq_len, dim), dtype=jnp.float32)
    cos, sin = precompute_freqs(head_dim, seq_len, start_pos)

    # KV cache: bf16, head-major (maxB, Hkv, maxT, Dh) so attention picks a GQA
    # group as a leading-dim block (pure DMA, no relayout).
    cache_k = jnp.zeros((max_batch, n_kv_heads, max_seq_len, head_dim), jnp.bfloat16)
    cache_v = jnp.zeros_like(cache_k)

    out, cache_k, cache_v = encoder_block(
        params, x, start_pos, cos, sin, cache_k, cache_v,
        n_heads, n_kv_heads, norm_eps)
    jax.block_until_ready((out, cache_k, cache_v))

    assert out.shape == (batch, seq_len, dim)
    assert cache_k.shape == (max_batch, n_kv_heads, max_seq_len, head_dim)

    ref = reference_encoder_block(
        dict(wq_t=wq_t, wk_t=wk_t, wv_t=wv_t, wo_t=wo_t, w1_t=w1_t, w3_t=w3_t,
             w2_t=w2_t, attn_norm_w=attn_norm_w, ffn_norm_w=ffn_norm_w),
        x, start_pos, cos, sin, n_heads, n_kv_heads, norm_eps,
        max_batch, max_seq_len)
    err = float(jnp.max(jnp.abs(out - ref)))
    assert err < 5e-2, f"mismatch vs fp32 reference: max abs err = {err}"
    print("KERNEL_OK")
</pallas_src>

<mosaic_0001>
module attributes {stable_mosaic.version = 11 : i64} {
  func.func @rmsnorm_matmul_kernel(%arg0: i32, %arg1: i32, %arg2: memref<16x64xf32, #tpu.memory_space<vmem>>, %arg3: memref<1x64xf32, #tpu.memory_space<vmem>>, %arg4: memref<64x128xbf16, #tpu.memory_space<vmem>>, %arg5: memref<16x128xbf16, #tpu.memory_space<vmem>>, %arg6: memref<16x64xbf16, #tpu.memory_space<vmem>>) attributes {dimension_semantics = [#tpu.dimension_semantics<parallel>, #tpu.dimension_semantics<arbitrary>], iteration_bounds = array<i64: 1, 1>, scalar_prefetch = 0 : i64, scratch_operands = 1 : i64, tpu.core_type = #tpu.core_type<tc>, window_params = [{transform_indices = @transform_0, window_bounds = array<i64: 16, 64>}, {pipeline_mode = #tpu.pipeline_mode<synchronous>, transform_indices = @transform_1, window_bounds = array<i64: 1, 64>}, {transform_indices = @transform_2, window_bounds = array<i64: 64, 128>}, {transform_indices = @transform_3, window_bounds = array<i64: 16, 128>}]} {
    %c0_i32 = arith.constant 0 : i32
    %0 = arith.cmpi eq, %arg1, %c0_i32 : i32
    %1 = arith.extui %0 : i1 to i32
    %c0_i32_0 = arith.constant 0 : i32
    %2 = arith.cmpi ne, %1, %c0_i32_0 : i32
    scf.if %2 {
      %c0_6 = arith.constant 0 : index
      %c0_7 = arith.constant 0 : index
      %8 = vector.load %arg2[%c0_6, %c0_7] : memref<16x64xf32, #tpu.memory_space<vmem>>, vector<16x64xf32>
      %9 = arith.mulf %8, %8 : vector<16x64xf32>
      %cst_8 = arith.constant dense<0.000000e+00> : vector<16xf32>
      %10 = vector.multi_reduction <add>, %9, %cst_8 [1] : vector<16x64xf32> to vector<16xf32>
      %11 = vector.shape_cast %10 : vector<16xf32> to vector<16x1xf32>
      %cst_9 = arith.constant 6.400000e+01 : f32
      %12 = vector.broadcast %cst_9 : f32 to vector<16x1xf32>
      %13 = arith.divf %11, %12 : vector<16x1xf32>
      %cst_10 = arith.constant 9.99999974E-6 : f32
      %14 = vector.broadcast %cst_10 : f32 to vector<16x1xf32>
      %15 = arith.addf %13, %14 : vector<16x1xf32>
      %16 = math.rsqrt %15 : vector<16x1xf32>
      %17 = vector.broadcast %16 : vector<16x1xf32> to vector<16x64xf32>
      %18 = arith.mulf %8, %17 : vector<16x64xf32>
      %c0_11 = arith.constant 0 : index
      %c0_12 = arith.constant 0 : index
      %19 = vector.load %arg3[%c0_11, %c0_12] : memref<1x64xf32, #tpu.memory_space<vmem>>, vector<1x64xf32>
      %20 = vector.broadcast %19 : vector<1x64xf32> to vector<16x64xf32>
      %21 = arith.mulf %18, %20 : vector<16x64xf32>
      %22 = arith.truncf %21 : vector<16x64xf32> to vector<16x64xbf16>
      %c0_13 = arith.constant 0 : index
      %c0_14 = arith.constant 0 : index
      %23 = vector.load %arg6[%c0_13, %c0_14] : memref<16x64xbf16, #tpu.memory_space<vmem>>, vector<16x64xbf16>
      tpu.vector_store %arg6[%c0_13, %c0_14], %22 {strides = array<i32>} : memref<16x64xbf16, #tpu.memory_space<vmem>>, vector<16x64xbf16>,
    } else {
    }
    %c0 = arith.constant 0 : index
    %c0_1 = arith.constant 0 : index
    %3 = vector.load %arg6[%c0, %c0_1] : memref<16x64xbf16, #tpu.memory_space<vmem>>, vector<16x64xbf16>
    %c0_2 = arith.constant 0 : index
    %c0_3 = arith.constant 0 : index
    %4 = vector.load %arg4[%c0_2, %c0_3] : memref<64x128xbf16, #tpu.memory_space<vmem>>, vector<64x128xbf16>
    %cst = arith.constant dense<0.000000e+00> : vector<16x128xf32>
    %5 = tpu.matmul %3, %4, %cst {dimension_numbers = #tpu.dot_dimension_numbers<[1], [0], [0], [1], [0, 0, 1, 1], [], []>} : vector<16x64xbf16>, vector<64x128xbf16>, vector<16x128xf32> -> vector<16x128xf32>
    %6 = arith.truncf %5 : vector<16x128xf32> to vector<16x128xbf16>
    %c0_4 = arith.constant 0 : index
    %c0_5 = arith.constant 0 : index
    %7 = vector.load %arg5[%c0_4, %c0_5] : memref<16x128xbf16, #tpu.memory_space<vmem>>, vector<16x128xbf16>
    tpu.vector_store %arg5[%c0_4, %c0_5], %6 {strides = array<i32>} : memref<16x128xbf16, #tpu.memory_space<vmem>>, vector<16x128xbf16>,
    return
  }
  func.func @transform_0(%arg0: i32, %arg1: i32) -> (i32, i32) {
    %c0_i32 = arith.constant 0 : i32
    %c0_i32_0 = arith.constant 0 : i32
    return %arg0, %c0_i32 : i32, i32
  }
  func.func @transform_1(%arg0: i32, %arg1: i32) -> (i32, i32) {
    %c0_i32 = arith.constant 0 : i32
    %c0_i32_0 = arith.constant 0 : i32
    %c0_i32_1 = arith.constant 0 : i32
    return %c0_i32, %c0_i32_0 : i32, i32
  }
  func.func @transform_2(%arg0: i32, %arg1: i32) -> (i32, i32) {
    %c0_i32 = arith.constant 0 : i32
    %c0_i32_0 = arith.constant 0 : i32
    return %c0_i32, %arg1 : i32, i32
  }
  func.func @transform_3(%arg0: i32, %arg1: i32) -> (i32, i32) {
    %c0_i32 = arith.constant 0 : i32
    return %arg0, %arg1 : i32, i32
  }
}

</mosaic_0001>

<bundles_post_ra>
// kernel: tpu_custom_call.1
= control target key start
LH: loop header
LB: loop body
LE: loop exit
PB: predicated region body
PF: predicated region fallthrough
CT: control target
= control target key end

     0   :  { %8 = vsyncpa [#allocation4], 0  ;;  %s384_s0 = inlined_call_operand.hbm [shape: f32[16,64], index: 0, kind: input, shape index: {}]   ;;  %s385_s1 = inlined_call_operand.vmem [shape: f32[1,64], index: 1, kind: input, shape index: {}]   ;;  %s386_s2 = inlined_call_operand.hbm [shape: bf16[64,128], index: 2, kind: input, shape index: {}]   ;;  %s387_s3 = inlined_call_operand.hbm [shape: bf16[16,128], index: 3, kind: output, shape index: {}]  }
   0x1   :  { %9 = vsyncpa [#allocation7], 0 }
   0x2   :  { %10 = vsyncpa [#allocation5], 0  ;;  %s306_s12 = smov [#allocation3]   ;;  %s234_s16 = scalar_lea.hbm %s384_s0, 256 }
   0x3   :  { %s16_s13 = sshll.u32 %s306_s12, 4  ;;  %p235_p0 = scmp.ne.s32.totalorder %s384_s0, %s234_s16  ;;  %s17_s13 = int_to_ptr.vmem [resolvable:$true] %s16_s13 }
   0x4   :  { %p238_p1 = scmp.lt.u32.totalorder %s234_s16, %s384_s0 }
   0x6   :  { %p240_p2 = pnand %p238_p1, %p235_p0 }
   0x8   :  { %243 = shalt.err (!%p240_p2)
}
   0x9   :  { %s244_s21 = scalar_lea.vmem %s17_s13, 256  ;;  %p249_p4 = scmp.lt.s32.totalorder %s17_s13, %s17_s13 }
   0xa   :  { %p245_p3 = scmp.ne.s32.totalorder %s17_s13, %s244_s21  ;;  %p250_p5 = scmp.lt.s32.totalorder %s244_s21, %s244_s21 }
   0xc   :  { %p251_p6 = por %p250_p5, %p249_p4 }
   0xe   :  { %p252_p7 = pnand %p251_p6, %p245_p3 }
  0x10   :  { %255 = shalt.err (!%p252_p7)
}
  0x11   :  { %s307_s22 = smov 128   ;;  %s308_s23 = smov 8  }
  0x12   :  { %22 = dma.hbm_to_vmem [thread:$0]  %s384_s0, 256, %s17_s13, [#allocation4], %s307_s22, %s307_s22, %s308_s23  }
  0x13   :  { %s309_s26 = smov [#allocation6]   ;;  %s256_s30 = scalar_lea.hbm %s386_s2, 512 }
  0x14   :  { %s30_s27 = sshll.u32 %s309_s26, 4  ;;  %p257_p8 = scmp.ne.s32.totalorder %s386_s2, %s256_s30  ;;  %s31_s27 = int_to_ptr.vmem [resolvable:$true] %s30_s27 }
  0x15   :  { %p260_p9 = scmp.lt.u32.totalorder %s256_s30, %s386_s2 }
  0x17   :  { %p262_p10 = pnand %p260_p9, %p257_p8 }
  0x19   :  { %265 = shalt.err (!%p262_p10)
}
  0x1a   :  { %s266_s8 = scalar_lea.vmem %s31_s27, 512  ;;  %p271_p12 = scmp.lt.s32.totalorder %s31_s27, %s31_s27 }
  0x1b   :  { %p267_p11 = scmp.ne.s32.totalorder %s31_s27, %s266_s8  ;;  %p272_p13 = scmp.lt.s32.totalorder %s266_s8, %s266_s8 }
  0x1d   :  { %p273_p0 = por %p272_p13, %p271_p12 }
  0x1f   :  { %p274_p1 = pnand %p273_p0, %p267_p11 }
  0x21   :  { %277 = shalt.err (!%p274_p1)
}
  0x22   :  { %s310_s0 = smov 64   ;;  %s311_s9 = smov 4  }
  0x23   :  { %36 = dma.hbm_to_vmem [thread:$0]  %s386_s2, 512, %s31_s27, [#allocation7], %s310_s0, %s310_s0, %s311_s9  }
  0x24   :  { %300 = dma.done.wait [#allocation4], 256  }
  0x25   :  { %301 = vsyncadd [#allocation4], 4294967040 }
  0x26   :  { %302 = dma.done.wait [#allocation7], 512  }
  0x27   :  { %303 = vsyncadd [#allocation7], 4294966784  ;;  %v48_v0 = vld [vmem:[#allocation3] sm:$0xff]  ;;  %vm52_vm0 = vcmask 523264   ;;  %v49_v1 = vld [vmem:[#allocation3 + $0x8] sm:$0xff]  ;;  %v312_v7 = vmov 0.0  }
  0x28   :  { %v50_v2 = vmul.f32 %v48_v0, %v48_v0  ;;  %v51_v3 = vmul.f32 %v49_v1, %v49_v1  ;;  %v226_v6 = vld [vmem:[#allocation6] sm:$0xff]   ;;  %205 = vmatprep.subr.bf16.mxu0 %v312_v7  ;;  %v227_v8 = vld [vmem:[#allocation6 + $0x8] sm:$0xff]   ;;  %v228_v9 = vld [vmem:[#allocation6 + $0x10] sm:$0xff]   ;;  %vm313_vm1 = vmmov 0   ;;  %s314_s13 = smov [#allocation8]  }
  0x29   :  { %206 = vmatpush3.bf16.msra.mxu0 %v226_v6  ;;  %v229_v10 = vld [vmem:[#allocation6 + $0x18] sm:$0xff]   ;;  %213 = vmatprep.mubr.msk.bf16.mxu0 %vm313_vm1, %v312_v7  ;;  %v185_v20 = vld [vmem:[%s385_s1] ss:$0 sm:$0xff]  ;;  %s172_s14 = sshll.u32 %s314_s13, 4  ;;  %s173_s14 = int_to_ptr.vmem [resolvable:$true] %s172_s14 }
  0x2a   :  { %v53_v4 = vsel %vm52_vm0, %v50_v2, 0.0  ;;  %v56_v5 = vsel %vm52_vm0, %v51_v3, 0.0  ;;  %207 = vmatprep.subr.bf16.mxu0 %v312_v7  ;;  %s278_s15 = scalar_lea.vmem %s173_s14, 128  ;;  %p283_p3 = scmp.lt.s32.totalorder %s173_s14, %s173_s14 }
  0x2b   :  { %54 = vadd.xlane.f32.xlu0 %v53_v4  ;;  %p279_p2 = scmp.ne.s32.totalorder %s173_s14, %s278_s15  ;;  %p284_p4 = scmp.lt.s32.totalorder %s278_s15, %s278_s15 }
  0x2d   :  { %208 = vmatpush3.bf16.msra.mxu0 %v227_v8  ;;  %p285_p5 = por %p284_p4, %p283_p3 }
  0x2e   :  { %209 = vmatprep.subr.bf16.mxu0 %v312_v7 }
  0x2f   :  { %57 = vadd.xlane.f32.xlu0 %v56_v5  ;;  %p286_p6 = pnand %p285_p5, %p279_p2 }
  0x31   :  { %210 = vmatpush3.bf16.msra.mxu0 %v228_v9 }
  0x32   :  { %211 = vmatprep.subr.bf16.mxu0 %v312_v7 }
  0x35   :  { %212 = vmatpush3.bf16.msra.mxu0 %v229_v10 }
  0xb8   :  { %v55_v11 = vpop.xlane.xlu0 %54 }
  0xb9   :  { %v60_v12 = vmul.f32 0.015625, %v55_v11 }
  0xbb   :  { %v62_v13 = vadd.f32 1e-05, %v60_v12 }
  0xbc   :  { %v58_v14 = vpop.xlane.xlu0 %57 }
  0xbd   :  { %230 = vrsqrt.f32 %v62_v13  ;;  %v61_v15 = vmul.f32 0.015625, %v58_v14 }
  0xbf   :  { %v63_v16 = vadd.f32 1e-05, %v61_v15 }
  0xc1   :  { %232 = vrsqrt.f32 %v63_v16 }
  0xc7   :  { %v231_v17 = vpop.eup %230 }
  0xc8   :  { %v66_v18 = vmul.f32 %v231_v17, %v48_v0 }
  0xca   :  { %v75_v22 = vmul.f32 %v185_v20, %v66_v18 }
  0xcb   :  { %v233_v19 = vpop.eup %232 }
  0xcc   :  { %v67_v21 = vmul.f32 %v233_v19, %v49_v1 }
  0xce   :  { %v76_v23 = vmul.f32 %v185_v20, %v67_v21 }
  0xd0   :  { %v77_v24 = vpack.c.bf16 %v76_v23, %v75_v22 }
  0xd2   :  { %78 = vst.msk [vmem:[#allocation2] sm:$0xff] %vm52_vm0, %v77_v24 }
  0xd9   :  { %v79_v25 = vld [vmem:[#allocation2] sm:$0xff] }
  0xda   :  { %214 = vmatmul.mubr.msk.bf16.vlgmr.msra.gmra.mrb[0].mxu0 %vm52_vm0, %v79_v25 }
 0x1ad   :  { %v150_v26 = vpop.f32.mrb[0].mxu0 }
 0x1ae   :  { %v215_v27 = vpop.f32.mrb[1].mxu0 }
 0x1af   :  { %v153_v28 = vpop.f32.mrb[2].mxu0 }
 0x1b0   :  { %v198_v29 = vpack.c.bf16 %v153_v28, %v150_v26  ;;  %v216_v30 = vpop.f32.mrb[3].mxu0 }
 0x1b2   :  { %199 = vst [vmem:[#allocation8] sm:$0xff] %v198_v29  }
 0x1b3   :  { %289 = shalt.err (!%p286_p6)
}
 0x1b4   :  { %s290_s17 = scalar_lea.hbm %s387_s3, 128 }
 0x1b5   :  { %p291_p7 = scmp.ne.s32.totalorder %s387_s3, %s290_s17  ;;  %p294_p8 = scmp.lt.u32.totalorder %s290_s17, %s387_s3 }
 0x1b7   :  { %p296_p9 = pnand %p294_p8, %p291_p7 }
 0x1b9   :  { %299 = shalt.err (!%p296_p9)
}
 0x1ba   :  { %178 = dma.vmem_to_hbm [thread:$0]  %s173_s14, 128, %s387_s3, [#allocation5], %s310_s0, %s310_s0, %s311_s9  }
 0x1bb   :  { %304 = dma.done.wait [#allocation5], 128  }
 0x1bc   :  { %305 = vsyncadd [#allocation5], 4294967168 }
 0x1bd   :  { %182 = vsyncpa [#allocation4], 1 }
 0x1be   :  { %183 = vsyncpa [#allocation7], 1 }
 0x1bf   :  { %184 = vsyncpa [#allocation5], 1 }

</bundles_post_ra>
